<compile_context>
chip_gen: v7x
topology: tpu7x:2x2x1
jax: 0.10.0
libtpu: 0.0.40
codegen_flags: <defaults>
</compile_context>

<pallas_src>
import math

import jax
import jax.numpy as jnp
from jax.experimental import pallas as pl
from jax.experimental.pallas import tpu as pltpu

LANES = 128   # lane width of a vreg / last-dim tile
HIDDEN = 10   # hidden width of the MLP


def mlp_kernel(params_ref, x_ref, o_ref):
    """VPU-only forward for one (block_rows, 128) lane-dense batch slab.

    params_ref: SMEM f32[3*HIDDEN + 1] = [w1(10) | b1(10) | w2(10) | b2(1)]
    x_ref, o_ref: VMEM (block_rows, 128) f32
    """
    x = x_ref[...]
    acc = jnp.zeros_like(x)
    # Unrolled 10-term fused multiply-add / relu chain; all scalar weights come
    # from SMEM and broadcast across the vreg lanes.
    for k in range(HIDDEN):
        h = jnp.maximum(x * params_ref[k] + params_ref[HIDDEN + k], 0.0)
        acc = acc + params_ref[2 * HIDDEN + k] * h
    o_ref[...] = (acc + params_ref[3 * HIDDEN]).astype(o_ref.dtype)


def simple_neural_network(x, w1, b1, w2, b2, *, max_block_rows=512):
    """Forward pass of SimpleNeuralNetwork.

    x:  (B, 1) float32
    w1: (1, 10), b1: (1, 10)   -- fully_connected_layer (transposed vs torch)
    w2: (10, 1), b2: (1, 1)    -- output_layer          (transposed vs torch)
    returns (B, 1) float32
    """
    B = x.shape[0]
    out_dtype = x.dtype

    # Pack the 31 network parameters into one small SMEM-resident vector.
    params = jnp.concatenate(
        [w1.reshape(-1), b1.reshape(-1), w2.reshape(-1), b2.reshape(-1)]
    ).astype(jnp.float32)

    # Lane-dense layout: batch -> (padded_rows, 128), rows padded to a sublane
    # multiple (8) and to a whole number of grid tiles.
    rows = max(1, math.ceil(B / LANES))
    rows8 = ((rows + 7) // 8) * 8                       # multiple of 8 sublanes
    block_rows = min(max_block_rows, rows8)             # multiple of 8, <= 512
    padded_rows = ((rows8 + block_rows - 1) // block_rows) * block_rows
    padded_total = padded_rows * LANES

    x_flat = x.reshape(-1).astype(jnp.float32)          # (B,) since in_features == 1
    x2d = jnp.pad(x_flat, (0, padded_total - B)).reshape(padded_rows, LANES)

    grid = (padded_rows // block_rows,)

    out2d = pl.pallas_call(
        mlp_kernel,
        out_shape=jax.ShapeDtypeStruct((padded_rows, LANES), jnp.float32),
        grid=grid,
        in_specs=[
            pl.BlockSpec(memory_space=pltpu.MemorySpace.SMEM),      # params (whole)
            pl.BlockSpec((block_rows, LANES), lambda i: (i, 0)),    # x slab
        ],
        out_specs=pl.BlockSpec((block_rows, LANES), lambda i: (i, 0)),
        compiler_params=pltpu.CompilerParams(
            dimension_semantics=("parallel",),
            vmem_limit_bytes=32 * 1024 * 1024,
        ),
    )(params, x2d)

    # Undo lane-dense padding: back to (B, 1).
    return out2d.reshape(-1)[:B].reshape(B, 1).astype(out_dtype)


if __name__ == "__main__":
    key = jax.random.PRNGKey(0)
    k_x, k_w1, k_b1, k_w2, k_b2 = jax.random.split(key, 5)

    batch = 8
    in_features, hidden, out_features = 1, HIDDEN, 1

    # Deterministic parameter init (uniform, PyTorch-Linear-like scale).
    w1 = jax.random.uniform(k_w1, (in_features, hidden), jnp.float32, -1.0, 1.0)
    b1 = jax.random.uniform(k_b1, (1, hidden), jnp.float32, -1.0, 1.0)
    w2 = jax.random.uniform(
        k_w2, (hidden, out_features), jnp.float32, -1.0, 1.0
    ) / jnp.sqrt(hidden)
    b2 = jax.random.uniform(k_b2, (1, out_features), jnp.float32, -1.0, 1.0)

    x = jax.random.normal(k_x, (batch, in_features), jnp.float32)

    out = simple_neural_network(x, w1, b1, w2, b2)
    out = jax.block_until_ready(out)

    # Pure-JAX reference check (same math as nn.Linear with transposed weights).
    ref = jnp.maximum(x @ w1 + b1, 0.0) @ w2 + b2
    assert out.shape == (batch, 1)
    assert jnp.allclose(out, ref, atol=1e-5), (out, ref)

    print("KERNEL_OK")
</pallas_src>

<mosaic_0001>
module attributes {stable_mosaic.version = 11 : i64} {
  func.func @mlp_kernel(%arg0: i32, %arg1: memref<31xf32, #tpu.memory_space<smem>>, %arg2: memref<8x128xf32, #tpu.memory_space<vmem>>, %arg3: memref<8x128xf32, #tpu.memory_space<vmem>>) attributes {dimension_semantics = [#tpu.dimension_semantics<parallel>], iteration_bounds = array<i64: 1>, scalar_prefetch = 0 : i64, scratch_operands = 0 : i64, tpu.core_type = #tpu.core_type<tc>, window_params = [{transform_indices = @transform_0, window_bounds = array<i64: 31>}, {transform_indices = @transform_1, window_bounds = array<i64: 8, 128>}, {transform_indices = @transform_2, window_bounds = array<i64: 8, 128>}]} {
    %c0 = arith.constant 0 : index
    %c0_0 = arith.constant 0 : index
    %0 = vector.load %arg2[%c0, %c0_0] : memref<8x128xf32, #tpu.memory_space<vmem>>, vector<8x128xf32>
    %cst = arith.constant 0.000000e+00 : f32
    %1 = vector.broadcast %cst : f32 to vector<8x128xf32>
    %c0_1 = arith.constant 0 : index
    %2 = memref.load %arg1[%c0_1] : memref<31xf32, #tpu.memory_space<smem>>
    %3 = vector.broadcast %2 : f32 to vector<8x128xf32>
    %4 = arith.mulf %0, %3 : vector<8x128xf32>
    %c10 = arith.constant 10 : index
    %5 = memref.load %arg1[%c10] : memref<31xf32, #tpu.memory_space<smem>>
    %6 = vector.broadcast %5 : f32 to vector<8x128xf32>
    %7 = arith.addf %4, %6 : vector<8x128xf32>
    %cst_2 = arith.constant 0.000000e+00 : f32
    %8 = vector.broadcast %cst_2 : f32 to vector<8x128xf32>
    %9 = arith.maximumf %7, %8 : vector<8x128xf32>
    %c20 = arith.constant 20 : index
    %10 = memref.load %arg1[%c20] : memref<31xf32, #tpu.memory_space<smem>>
    %11 = vector.broadcast %10 : f32 to vector<8x128xf32>
    %12 = arith.mulf %11, %9 : vector<8x128xf32>
    %13 = arith.addf %1, %12 : vector<8x128xf32>
    %c1 = arith.constant 1 : index
    %14 = memref.load %arg1[%c1] : memref<31xf32, #tpu.memory_space<smem>>
    %15 = vector.broadcast %14 : f32 to vector<8x128xf32>
    %16 = arith.mulf %0, %15 : vector<8x128xf32>
    %c11 = arith.constant 11 : index
    %17 = memref.load %arg1[%c11] : memref<31xf32, #tpu.memory_space<smem>>
    %18 = vector.broadcast %17 : f32 to vector<8x128xf32>
    %19 = arith.addf %16, %18 : vector<8x128xf32>
    %cst_3 = arith.constant 0.000000e+00 : f32
    %20 = vector.broadcast %cst_3 : f32 to vector<8x128xf32>
    %21 = arith.maximumf %19, %20 : vector<8x128xf32>
    %c21 = arith.constant 21 : index
    %22 = memref.load %arg1[%c21] : memref<31xf32, #tpu.memory_space<smem>>
    %23 = vector.broadcast %22 : f32 to vector<8x128xf32>
    %24 = arith.mulf %23, %21 : vector<8x128xf32>
    %25 = arith.addf %13, %24 : vector<8x128xf32>
    %c2 = arith.constant 2 : index
    %26 = memref.load %arg1[%c2] : memref<31xf32, #tpu.memory_space<smem>>
    %27 = vector.broadcast %26 : f32 to vector<8x128xf32>
    %28 = arith.mulf %0, %27 : vector<8x128xf32>
    %c12 = arith.constant 12 : index
    %29 = memref.load %arg1[%c12] : memref<31xf32, #tpu.memory_space<smem>>
    %30 = vector.broadcast %29 : f32 to vector<8x128xf32>
    %31 = arith.addf %28, %30 : vector<8x128xf32>
    %cst_4 = arith.constant 0.000000e+00 : f32
    %32 = vector.broadcast %cst_4 : f32 to vector<8x128xf32>
    %33 = arith.maximumf %31, %32 : vector<8x128xf32>
    %c22 = arith.constant 22 : index
    %34 = memref.load %arg1[%c22] : memref<31xf32, #tpu.memory_space<smem>>
    %35 = vector.broadcast %34 : f32 to vector<8x128xf32>
    %36 = arith.mulf %35, %33 : vector<8x128xf32>
    %37 = arith.addf %25, %36 : vector<8x128xf32>
    %c3 = arith.constant 3 : index
    %38 = memref.load %arg1[%c3] : memref<31xf32, #tpu.memory_space<smem>>
    %39 = vector.broadcast %38 : f32 to vector<8x128xf32>
    %40 = arith.mulf %0, %39 : vector<8x128xf32>
    %c13 = arith.constant 13 : index
    %41 = memref.load %arg1[%c13] : memref<31xf32, #tpu.memory_space<smem>>
    %42 = vector.broadcast %41 : f32 to vector<8x128xf32>
    %43 = arith.addf %40, %42 : vector<8x128xf32>
    %cst_5 = arith.constant 0.000000e+00 : f32
    %44 = vector.broadcast %cst_5 : f32 to vector<8x128xf32>
    %45 = arith.maximumf %43, %44 : vector<8x128xf32>
    %c23 = arith.constant 23 : index
    %46 = memref.load %arg1[%c23] : memref<31xf32, #tpu.memory_space<smem>>
    %47 = vector.broadcast %46 : f32 to vector<8x128xf32>
    %48 = arith.mulf %47, %45 : vector<8x128xf32>
    %49 = arith.addf %37, %48 : vector<8x128xf32>
    %c4 = arith.constant 4 : index
    %50 = memref.load %arg1[%c4] : memref<31xf32, #tpu.memory_space<smem>>
    %51 = vector.broadcast %50 : f32 to vector<8x128xf32>
    %52 = arith.mulf %0, %51 : vector<8x128xf32>
    %c14 = arith.constant 14 : index
    %53 = memref.load %arg1[%c14] : memref<31xf32, #tpu.memory_space<smem>>
    %54 = vector.broadcast %53 : f32 to vector<8x128xf32>
    %55 = arith.addf %52, %54 : vector<8x128xf32>
    %cst_6 = arith.constant 0.000000e+00 : f32
    %56 = vector.broadcast %cst_6 : f32 to vector<8x128xf32>
    %57 = arith.maximumf %55, %56 : vector<8x128xf32>
    %c24 = arith.constant 24 : index
    %58 = memref.load %arg1[%c24] : memref<31xf32, #tpu.memory_space<smem>>
    %59 = vector.broadcast %58 : f32 to vector<8x128xf32>
    %60 = arith.mulf %59, %57 : vector<8x128xf32>
    %61 = arith.addf %49, %60 : vector<8x128xf32>
    %c5 = arith.constant 5 : index
    %62 = memref.load %arg1[%c5] : memref<31xf32, #tpu.memory_space<smem>>
    %63 = vector.broadcast %62 : f32 to vector<8x128xf32>
    %64 = arith.mulf %0, %63 : vector<8x128xf32>
    %c15 = arith.constant 15 : index
    %65 = memref.load %arg1[%c15] : memref<31xf32, #tpu.memory_space<smem>>
    %66 = vector.broadcast %65 : f32 to vector<8x128xf32>
    %67 = arith.addf %64, %66 : vector<8x128xf32>
    %cst_7 = arith.constant 0.000000e+00 : f32
    %68 = vector.broadcast %cst_7 : f32 to vector<8x128xf32>
    %69 = arith.maximumf %67, %68 : vector<8x128xf32>
    %c25 = arith.constant 25 : index
    %70 = memref.load %arg1[%c25] : memref<31xf32, #tpu.memory_space<smem>>
    %71 = vector.broadcast %70 : f32 to vector<8x128xf32>
    %72 = arith.mulf %71, %69 : vector<8x128xf32>
    %73 = arith.addf %61, %72 : vector<8x128xf32>
    %c6 = arith.constant 6 : index
    %74 = memref.load %arg1[%c6] : memref<31xf32, #tpu.memory_space<smem>>
    %75 = vector.broadcast %74 : f32 to vector<8x128xf32>
    %76 = arith.mulf %0, %75 : vector<8x128xf32>
    %c16 = arith.constant 16 : index
    %77 = memref.load %arg1[%c16] : memref<31xf32, #tpu.memory_space<smem>>
    %78 = vector.broadcast %77 : f32 to vector<8x128xf32>
    %79 = arith.addf %76, %78 : vector<8x128xf32>
    %cst_8 = arith.constant 0.000000e+00 : f32
    %80 = vector.broadcast %cst_8 : f32 to vector<8x128xf32>
    %81 = arith.maximumf %79, %80 : vector<8x128xf32>
    %c26 = arith.constant 26 : index
    %82 = memref.load %arg1[%c26] : memref<31xf32, #tpu.memory_space<smem>>
    %83 = vector.broadcast %82 : f32 to vector<8x128xf32>
    %84 = arith.mulf %83, %81 : vector<8x128xf32>
    %85 = arith.addf %73, %84 : vector<8x128xf32>
    %c7 = arith.constant 7 : index
    %86 = memref.load %arg1[%c7] : memref<31xf32, #tpu.memory_space<smem>>
    %87 = vector.broadcast %86 : f32 to vector<8x128xf32>
    %88 = arith.mulf %0, %87 : vector<8x128xf32>
    %c17 = arith.constant 17 : index
    %89 = memref.load %arg1[%c17] : memref<31xf32, #tpu.memory_space<smem>>
    %90 = vector.broadcast %89 : f32 to vector<8x128xf32>
    %91 = arith.addf %88, %90 : vector<8x128xf32>
    %cst_9 = arith.constant 0.000000e+00 : f32
    %92 = vector.broadcast %cst_9 : f32 to vector<8x128xf32>
    %93 = arith.maximumf %91, %92 : vector<8x128xf32>
    %c27 = arith.constant 27 : index
    %94 = memref.load %arg1[%c27] : memref<31xf32, #tpu.memory_space<smem>>
    %95 = vector.broadcast %94 : f32 to vector<8x128xf32>
    %96 = arith.mulf %95, %93 : vector<8x128xf32>
    %97 = arith.addf %85, %96 : vector<8x128xf32>
    %c8 = arith.constant 8 : index
    %98 = memref.load %arg1[%c8] : memref<31xf32, #tpu.memory_space<smem>>
    %99 = vector.broadcast %98 : f32 to vector<8x128xf32>
    %100 = arith.mulf %0, %99 : vector<8x128xf32>
    %c18 = arith.constant 18 : index
    %101 = memref.load %arg1[%c18] : memref<31xf32, #tpu.memory_space<smem>>
    %102 = vector.broadcast %101 : f32 to vector<8x128xf32>
    %103 = arith.addf %100, %102 : vector<8x128xf32>
    %cst_10 = arith.constant 0.000000e+00 : f32
    %104 = vector.broadcast %cst_10 : f32 to vector<8x128xf32>
    %105 = arith.maximumf %103, %104 : vector<8x128xf32>
    %c28 = arith.constant 28 : index
    %106 = memref.load %arg1[%c28] : memref<31xf32, #tpu.memory_space<smem>>
    %107 = vector.broadcast %106 : f32 to vector<8x128xf32>
    %108 = arith.mulf %107, %105 : vector<8x128xf32>
    %109 = arith.addf %97, %108 : vector<8x128xf32>
    %c9 = arith.constant 9 : index
    %110 = memref.load %arg1[%c9] : memref<31xf32, #tpu.memory_space<smem>>
    %111 = vector.broadcast %110 : f32 to vector<8x128xf32>
    %112 = arith.mulf %0, %111 : vector<8x128xf32>
    %c19 = arith.constant 19 : index
    %113 = memref.load %arg1[%c19] : memref<31xf32, #tpu.memory_space<smem>>
    %114 = vector.broadcast %113 : f32 to vector<8x128xf32>
    %115 = arith.addf %112, %114 : vector<8x128xf32>
    %cst_11 = arith.constant 0.000000e+00 : f32
    %116 = vector.broadcast %cst_11 : f32 to vector<8x128xf32>
    %117 = arith.maximumf %115, %116 : vector<8x128xf32>
    %c29 = arith.constant 29 : index
    %118 = memref.load %arg1[%c29] : memref<31xf32, #tpu.memory_space<smem>>
    %119 = vector.broadcast %118 : f32 to vector<8x128xf32>
    %120 = arith.mulf %119, %117 : vector<8x128xf32>
    %121 = arith.addf %109, %120 : vector<8x128xf32>
    %c30 = arith.constant 30 : index
    %122 = memref.load %arg1[%c30] : memref<31xf32, #tpu.memory_space<smem>>
    %123 = vector.broadcast %122 : f32 to vector<8x128xf32>
    %124 = arith.addf %121, %123 : vector<8x128xf32>
    %c0_12 = arith.constant 0 : index
    %c0_13 = arith.constant 0 : index
    %125 = vector.load %arg3[%c0_12, %c0_13] : memref<8x128xf32, #tpu.memory_space<vmem>>, vector<8x128xf32>
    tpu.vector_store %arg3[%c0_12, %c0_13], %124 {strides = array<i32>} : memref<8x128xf32, #tpu.memory_space<vmem>>, vector<8x128xf32>,
    return
  }
  func.func @transform_0(%arg0: i32) -> i32 {
    %c0_i32 = arith.constant 0 : i32
    %c0_i32_0 = arith.constant 0 : i32
    return %c0_i32 : i32
  }
  func.func @transform_1(%arg0: i32) -> (i32, i32) {
    %c0_i32 = arith.constant 0 : i32
    %c0_i32_0 = arith.constant 0 : i32
    return %arg0, %c0_i32 : i32, i32
  }
  func.func @transform_2(%arg0: i32) -> (i32, i32) {
    %c0_i32 = arith.constant 0 : i32
    %c0_i32_0 = arith.constant 0 : i32
    return %arg0, %c0_i32 : i32, i32
  }
}

</mosaic_0001>

<bundles_post_ra>
// kernel: tpu_custom_call.1
= control target key start
LH: loop header
LB: loop body
LE: loop exit
PB: predicated region body
PF: predicated region fallthrough
CT: control target
= control target key end

     0   :  { %7 = vsyncpa [#allocation5], 0  ;;  %s397_s0 = inlined_call_operand.hbm [shape: f32[31], index: 0, kind: input, shape index: {}]   ;;  %s398_s1 = inlined_call_operand.hbm [shape: f32[8,128], index: 1, kind: input, shape index: {}]   ;;  %s399_s2 = inlined_call_operand.hbm [shape: f32[8,128], index: 2, kind: output, shape index: {}]  }
   0x1   :  { %8 = vsyncpa [#allocation3], 0 }
   0x2   :  { %9 = vsyncpa [#allocation4], 0  ;;  %s199_s11 = scalar_lea.hbm %s397_s0, 16 }
   0x3   :  { %p200_p0 = scmp.ne.s32.totalorder %s397_s0, %s199_s11  ;;  %p203_p1 = scmp.lt.u32.totalorder %s199_s11, %s397_s0 }
   0x5   :  { %p205_p2 = pnand %p203_p1, %p200_p0 }
   0x7   :  { %208 = shalt.err (!%p205_p2)
}
   0x8   :  { %s259_s16 = smov [#allocation2]   ;;  %s260_s19 = smov [#allocation6]  }
   0x9   :  { %17 = dma.hbm_to_smem %s397_s0, 16, %s259_s16, [#allocation5]  }
   0xa   :  { %s24_s20 = sshll.u32 %s260_s19, 4  ;;  %s209_s23 = scalar_lea.hbm %s398_s1, 128  ;;  %s25_s20 = int_to_ptr.vmem [resolvable:$true] %s24_s20 }
   0xb   :  { %p210_p3 = scmp.ne.s32.totalorder %s398_s1, %s209_s23  ;;  %p213_p4 = scmp.lt.u32.totalorder %s209_s23, %s398_s1 }
   0xd   :  { %p215_p5 = pnand %p213_p4, %p210_p3 }
   0xf   :  { %218 = shalt.err (!%p215_p5)
}
  0x10   :  { %s219_s28 = scalar_lea.vmem %s25_s20, 128  ;;  %p224_p7 = scmp.lt.s32.totalorder %s25_s20, %s25_s20 }
  0x11   :  { %p220_p6 = scmp.ne.s32.totalorder %s25_s20, %s219_s28  ;;  %p225_p8 = scmp.lt.s32.totalorder %s219_s28, %s219_s28 }
  0x13   :  { %p226_p9 = por %p225_p8, %p224_p7 }
  0x15   :  { %p227_p10 = pnand %p226_p9, %p220_p6 }
  0x17   :  { %230 = shalt.err (!%p227_p10)
}
  0x18   :  { %27 = dma.hbm_to_vmem [thread:$0]  %s398_s1, 128, %s25_s20, [#allocation3]  }
  0x19   :  { %253 = dma.done.wait [#allocation5], 16  }
  0x1a   :  { %254 = vsyncadd [#allocation5], 4294967280 }
  0x1b   :  { %255 = dma.done.wait [#allocation3], 128  }
  0x1c   :  { %256 = vsyncadd [#allocation3], 4294967168 }
  0x1d   :  { %34 = sfence }
  0x1e   :  { %s36_s30 = sld [smem:[#allocation2]]  ;;  %s166_s3 = sld [smem:[#allocation2 + $0xa]]  ;;  %v307_v0 = vld [vmem:[#allocation6] sm:$0xff] }
  0x1f   :  { %s301_s4 = sld [smem:[#allocation2 + $0x14]]  ;;  %s168_s5 = sld [smem:[#allocation2 + $0x1]] }
  0x20   :  { %s169_s6 = sld [smem:[#allocation2 + $0xb]]  ;;  %s303_s7 = sld [smem:[#allocation2 + $0x15]] }
  0x21   :  { %s171_s8 = sld [smem:[#allocation2 + $0x2]]  ;;  %s305_s9 = sld [smem:[#allocation2 + $0xc]] }
  0x22   :  { %s309_s10 = sld [smem:[#allocation2 + $0x16]]  ;;  %s174_s1 = sld [smem:[#allocation2 + $0x3]] }
  0x23   :  { %s311_s11 = sld [smem:[#allocation2 + $0xd]]  ;;  %s313_s12 = sld [smem:[#allocation2 + $0x17]] }
  0x24   :  { %v37_v1 = vstv %s36_s30  ;;  %v40_v2 = vstv %s166_s3  ;;  %s315_s13 = sld [smem:[#allocation2 + $0x4]]  ;;  %s317_s14 = sld [smem:[#allocation2 + $0xe]] }
  0x25   :  { %v38_v3 = vmul.f32 %v37_v1, %v307_v0  ;;  %v48_v4 = vstv %s168_s5  ;;  %s320_s15 = sld [smem:[#allocation2 + $0x18]]  ;;  %s322_s16 = sld [smem:[#allocation2 + $0x5]]  ;;  %v44_v8 = vstv %s301_s4 }
  0x26   :  { %v49_v5 = vmul.f32 %v48_v4, %v307_v0  ;;  %v51_v6 = vstv %s169_s6  ;;  %s325_s17 = sld [smem:[#allocation2 + $0xf]]  ;;  %s329_s18 = sld [smem:[#allocation2 + $0x6]]  ;;  %v55_v12 = vstv %s303_s7 }
  0x27   :  { %v41_v7 = vadd.f32 %v40_v2, %v38_v3  ;;  %v59_v9 = vstv %s171_s8  ;;  %v62_v10 = vstv %s305_s9  ;;  %s331_s19 = sld [smem:[#allocation2 + $0x10]]  ;;  %s335_s20 = sld [smem:[#allocation2 + $0x19]] }
  0x28   :  { %v52_v11 = vadd.f32 %v51_v6, %v49_v5  ;;  %v60_v13 = vmul.f32 %v59_v9, %v307_v0  ;;  %v70_v14 = vstv %s174_s1  ;;  %s337_s21 = sld [smem:[#allocation2 + $0x7]]  ;;  %v66_v16 = vstv %s309_s10  ;;  %s342_s22 = sld [smem:[#allocation2 + $0x1a]] }
  0x29   :  { %v42_v15 = vmax.f32 %v41_v7, 0.0  ;;  %v71_v17 = vmul.f32 %v70_v14, %v307_v0  ;;  %v73_v18 = vstv %s311_s11  ;;  %s344_s23 = sld [smem:[#allocation2 + $0x11]]  ;;  %s348_s24 = sld [smem:[#allocation2 + $0x8]]  ;;  %v77_v25 = vstv %s313_s12 }
  0x2a   :  { %v53_v19 = vmax.f32 %v52_v11, 0.0  ;;  %v63_v20 = vadd.f32 %v62_v10, %v60_v13  ;;  %v81_v21 = vstv %s315_s13  ;;  %v84_v22 = vstv %s317_s14  ;;  %s350_s25 = sld [smem:[#allocation2 + $0x12]]  ;;  %s354_s26 = sld [smem:[#allocation2 + $0x1b]] }
  0x2b   :  { %v45_v23 = vmul.f32 %v44_v8, %v42_v15  ;;  %v74_v24 = vadd.f32 %v73_v18, %v71_v17  ;;  %v82_v26 = vmul.f32 %v81_v21, %v307_v0  ;;  %v92_v29 = vstv %s322_s16  ;;  %s358_s27 = sld [smem:[#allocation2 + $0x9]]  ;;  %s360_s28 = sld [smem:[#allocation2 + $0x13]] }
  0x2c   :  { %v56_v27 = vmul.f32 %v55_v12, %v53_v19  ;;  %v64_v28 = vmax.f32 %v63_v20, 0.0  ;;  %v95_v30 = vstv %s325_s17  ;;  %v88_v33 = vstv %s320_s15  ;;  %s366_s0 = sld [smem:[#allocation2 + $0x1c]]  ;;  %s372_s29 = sld [smem:[#allocation2 + $0x1d]] }
  0x2d   :  { %v75_v31 = vmax.f32 %v74_v24, 0.0  ;;  %v85_v32 = vadd.f32 %v84_v22, %v82_v26  ;;  %v93_v34 = vmul.f32 %v92_v29, %v307_v0  ;;  %v103_v37 = vstv %s329_s18  ;;  %s195_s30 = sld [smem:[#allocation2 + $0x1e]]  ;;  %s261_s3 = smov [#allocation7]  }
  0x2e   :  { %v57_v35 = vadd.f32 %v56_v27, %v45_v23  ;;  %v67_v36 = vmul.f32 %v66_v16, %v64_v28  ;;  %v106_v38 = vstv %s331_s19  ;;  %v104_v42 = vmul.f32 %v103_v37, %v307_v0  ;;  %s156_s4 = sshll.u32 %s261_s3, 4  ;;  %s157_s4 = int_to_ptr.vmem [resolvable:$true] %s156_s4 }
  0x2f   :  { %v78_v39 = vmul.f32 %v77_v25, %v75_v31  ;;  %v86_v40 = vmax.f32 %v85_v32, 0.0  ;;  %v96_v41 = vadd.f32 %v95_v30, %v93_v34  ;;  %v99_v44 = vstv %s335_s20  ;;  %s231_s5 = scalar_lea.vmem %s157_s4, 128  ;;  %p236_p12 = scmp.lt.s32.totalorder %s157_s4, %s157_s4 }
  0x30   :  { %v68_v43 = vadd.f32 %v67_v36, %v57_v35  ;;  %v114_v45 = vstv %s337_s21  ;;  %v117_v46 = vstv %s344_s23  ;;  %v107_v49 = vadd.f32 %v106_v38, %v104_v42  ;;  %p232_p11 = scmp.ne.s32.totalorder %s157_s4, %s231_s5  ;;  %p237_p13 = scmp.lt.s32.totalorder %s231_s5, %s231_s5 }
  0x31   :  { %v89_v47 = vmul.f32 %v88_v33, %v86_v40  ;;  %v97_v48 = vmax.f32 %v96_v41, 0.0  ;;  %v115_v50 = vmul.f32 %v114_v45, %v307_v0  ;;  %v110_v52 = vstv %s342_s22 }
  0x32   :  { %v79_v51 = vadd.f32 %v78_v39, %v68_v43  ;;  %v125_v53 = vstv %s348_s24  ;;  %v128_v54 = vstv %s350_s25  ;;  %v108_v56 = vmax.f32 %v107_v49, 0.0  ;;  %p238_p0 = por %p237_p13, %p236_p12 }
  0x33   :  { %v100_v55 = vmul.f32 %v99_v44, %v97_v48  ;;  %v118_v57 = vadd.f32 %v117_v46, %v115_v50  ;;  %v126_v58 = vmul.f32 %v125_v53, %v307_v0  ;;  %v121_v60 = vstv %s354_s26 }
  0x34   :  { %v90_v59 = vadd.f32 %v89_v47, %v79_v51  ;;  %v136_v61 = vstv %s358_s27  ;;  %v139_v62 = vstv %s360_s28  ;;  %v111_v63 = vmul.f32 %v110_v52, %v108_v56  ;;  %p239_p1 = pnand %p238_p0, %p232_p11 }
  0x35   :  { %v119_v1 = vmax.f32 %v118_v57, 0.0  ;;  %v129_v2 = vadd.f32 %v128_v54, %v126_v58  ;;  %v137_v3 = vmul.f32 %v136_v61, %v307_v0  ;;  %v132_v5 = vstv %s366_s0 }
  0x36   :  { %v101_v4 = vadd.f32 %v100_v55, %v90_v59  ;;  %v143_v10 = vstv %s372_s29  ;;  %v147_v16 = vstv %s195_s30 }
  0x37   :  { %v122_v6 = vmul.f32 %v121_v60, %v119_v1  ;;  %v130_v7 = vmax.f32 %v129_v2, 0.0  ;;  %v140_v8 = vadd.f32 %v139_v62, %v137_v3 }
  0x38   :  { %v112_v9 = vadd.f32 %v111_v63, %v101_v4 }
  0x39   :  { %v133_v11 = vmul.f32 %v132_v5, %v130_v7  ;;  %v141_v12 = vmax.f32 %v140_v8, 0.0 }
  0x3a   :  { %v123_v13 = vadd.f32 %v122_v6, %v112_v9 }
  0x3b   :  { %v144_v14 = vmul.f32 %v143_v10, %v141_v12 }
  0x3c   :  { %v134_v15 = vadd.f32 %v133_v11, %v123_v13 }
  0x3e   :  { %v145_v17 = vadd.f32 %v144_v14, %v134_v15 }
  0x40   :  { %v148_v18 = vadd.f32 %v147_v16, %v145_v17 }
  0x42   :  { %149 = vst [vmem:[#allocation7] sm:$0xff] %v148_v18 }
  0x43   :  { %242 = shalt.err (!%p239_p1)
}
  0x44   :  { %s243_s8 = scalar_lea.hbm %s399_s2, 128 }
  0x45   :  { %p244_p2 = scmp.ne.s32.totalorder %s399_s2, %s243_s8  ;;  %p247_p3 = scmp.lt.u32.totalorder %s243_s8, %s399_s2 }
  0x47   :  { %p249_p4 = pnand %p247_p3, %p244_p2 }
  0x49   :  { %252 = shalt.err (!%p249_p4)
}
  0x4a   :  { %159 = dma.vmem_to_hbm [thread:$0]  %s157_s4, 128, %s399_s2, [#allocation4]  }
  0x4b   :  { %257 = dma.done.wait [#allocation4], 128  }
  0x4c   :  { %258 = vsyncadd [#allocation4], 4294967168 }
  0x4d   :  { %163 = vsyncpa [#allocation3], 1 }
  0x4e   :  { %164 = vsyncpa [#allocation4], 1 }
  0x4f   :  { %165 = vsyncpa [#allocation5], 1 }

</bundles_post_ra>
